<compile_context>
chip_gen: v5e
topology: v5e:2x2
jax: 0.10.0
libtpu: 0.0.40
codegen_flags: <defaults>
</compile_context>

<pallas_src>
import math

import jax
import jax.numpy as jnp
from jax.experimental import pallas as pl
from jax.experimental.pallas import tpu as pltpu

LANES = 128
SUBLANES = 8
MAX_BLOCK_ROWS = 1024  # 1024 x 128 f32 = 512 KiB per buffer (double-buffered OK)


def _drop_path_kernel(scale_ref, x_ref, o_ref):
    # scale_ref: SMEM (N,) f32        per-sample scale = floor(keep_prob + U) / keep_prob
    # x_ref:     VMEM (1, row_tile, 128) lane-dense block of sample n (original dtype)
    # o_ref:     VMEM (1, row_tile, 128) same dtype as input
    n = pl.program_id(0)
    s = scale_ref[n]
    o_ref[...] = (x_ref[...].astype(jnp.float32) * s).astype(o_ref.dtype)


def drop_path(x, drop_prob: float = 0.0, training: bool = False, *, rng_key=None):
    """Per-sample stochastic depth, same semantics as the PyTorch module."""
    if drop_prob == 0.0 or not training:
        return x  # identity, exactly like the PyTorch forward

    if rng_key is None:
        rng_key = jax.random.PRNGKey(0)

    N = x.shape[0]
    keep_prob = 1.0 - float(drop_prob)

    # Per-sample keep mask via the same floor trick as the PyTorch reference.
    u = jax.random.uniform(rng_key, (N,), dtype=jnp.float32)
    scale = (jnp.floor(keep_prob + u) / keep_prob).astype(jnp.float32)  # (N,)

    # ---- lane-dense layout: flatten per-sample features, pad to (8k, 128) ----
    orig_shape = x.shape
    orig_dtype = x.dtype
    feat = math.prod(orig_shape[1:])

    tile = SUBLANES * LANES                      # 1024 elems per full vreg tile
    feat_p = ((feat + tile - 1) // tile) * tile  # rows % 8 == 0
    rows = feat_p // LANES

    # Bound VMEM: tile the row axis if a single sample slab would be too big.
    if rows <= MAX_BLOCK_ROWS:
        row_tile = rows
        rows_p = rows
    else:
        row_tile = MAX_BLOCK_ROWS
        rows_p = ((rows + row_tile - 1) // row_tile) * row_tile
    feat_pp = rows_p * LANES

    xf = x.reshape(N, feat)
    if feat_pp != feat:
        xf = jnp.pad(xf, ((0, 0), (0, feat_pp - feat)))
    x3 = xf.reshape(N, rows_p, LANES)

    grid = (N, rows_p // row_tile)

    out3 = pl.pallas_call(
        _drop_path_kernel,
        out_shape=jax.ShapeDtypeStruct((N, rows_p, LANES), orig_dtype),
        grid=grid,
        in_specs=[
            # per-sample scalars -> SMEM (whole array, no tiling)
            pl.BlockSpec(memory_space=pltpu.MemorySpace.SMEM),
            # one lane-dense row-tile of one sample per grid step
            pl.BlockSpec((1, row_tile, LANES), lambda n, r: (n, r, 0)),
        ],
        out_specs=pl.BlockSpec((1, row_tile, LANES), lambda n, r: (n, r, 0)),
        compiler_params=pltpu.CompilerParams(
            dimension_semantics=("parallel", "parallel")),
    )(scale, x3)

    out = out3.reshape(N, feat_pp)[:, :feat].reshape(orig_shape)
    return out


def reference_drop_path(x, drop_prob, training, u):
    """Pure-JAX mirror of the PyTorch drop_path (same uniforms `u`)."""
    if drop_prob == 0.0 or not training:
        return x
    keep_prob = 1.0 - drop_prob
    shape = (x.shape[0],) + (1,) * (x.ndim - 1)
    random_tensor = jnp.floor(keep_prob + u).reshape(shape)
    return (x / keep_prob) * random_tensor


if __name__ == "__main__":
    N, C, H, W = 2, 4, 16, 16
    key = jax.random.PRNGKey(0)
    kx, kd = jax.random.split(key)

    x = jax.random.normal(kx, (N, C, H, W), jnp.float32)

    # --- eval mode (or drop_prob == 0): identity, matches PyTorch exactly ---
    out_eval = drop_path(x, drop_prob=0.2, training=False)
    out_eval = jax.block_until_ready(out_eval)
    assert out_eval.shape == x.shape
    assert jnp.array_equal(out_eval, x)

    # --- training mode: per-sample stochastic depth through the kernel ---
    drop_prob = 0.25
    out_train = drop_path(x, drop_prob=drop_prob, training=True, rng_key=kd)
    out_train = jax.block_until_ready(out_train)

    u = jax.random.uniform(kd, (N,), dtype=jnp.float32)  # same draws as wrapper
    ref = reference_drop_path(x, drop_prob, True, u)

    assert out_train.shape == (N, C, H, W)
    assert jnp.allclose(out_train, ref, rtol=1e-5, atol=1e-5), (
        f"max abs err {jnp.max(jnp.abs(out_train - ref))}")

    print("KERNEL_OK")
</pallas_src>

<mosaic_0001>
module attributes {stable_mosaic.version = 11 : i64} {
  func.func @_drop_path_kernel(%arg0: i32, %arg1: i32, %arg2: memref<2xf32, #tpu.memory_space<smem>>, %arg3: memref<1x8x128xf32, #tpu.memory_space<vmem>>, %arg4: memref<1x8x128xf32, #tpu.memory_space<vmem>>) attributes {dimension_semantics = [#tpu.dimension_semantics<parallel>, #tpu.dimension_semantics<parallel>], iteration_bounds = array<i64: 2, 1>, scalar_prefetch = 0 : i64, scratch_operands = 0 : i64, tpu.core_type = #tpu.core_type<tc>, window_params = [{transform_indices = @transform_0, window_bounds = array<i64: 2>}, {transform_indices = @transform_1, window_bounds = array<i64: 1, 8, 128>}, {transform_indices = @transform_2, window_bounds = array<i64: 1, 8, 128>}]} {
    %0 = arith.index_cast %arg0 : i32 to index
    %1 = memref.load %arg2[%0] : memref<2xf32, #tpu.memory_space<smem>>
    %c0 = arith.constant 0 : index
    %c0_0 = arith.constant 0 : index
    %c0_1 = arith.constant 0 : index
    %2 = vector.load %arg3[%c0, %c0_0, %c0_1] : memref<1x8x128xf32, #tpu.memory_space<vmem>>, vector<1x8x128xf32>
    %3 = vector.broadcast %1 : f32 to vector<1x8x128xf32>
    %4 = arith.mulf %2, %3 : vector<1x8x128xf32>
    %c0_2 = arith.constant 0 : index
    %c0_3 = arith.constant 0 : index
    %c0_4 = arith.constant 0 : index
    %5 = vector.load %arg4[%c0_2, %c0_3, %c0_4] : memref<1x8x128xf32, #tpu.memory_space<vmem>>, vector<1x8x128xf32>
    tpu.vector_store %arg4[%c0_2, %c0_3, %c0_4], %4 {strides = array<i32>} : memref<1x8x128xf32, #tpu.memory_space<vmem>>, vector<1x8x128xf32>,
    return
  }
  func.func @transform_0(%arg0: i32, %arg1: i32) -> i32 {
    %c0_i32 = arith.constant 0 : i32
    %c0_i32_0 = arith.constant 0 : i32
    return %c0_i32 : i32
  }
  func.func @transform_1(%arg0: i32, %arg1: i32) -> (i32, i32, i32) {
    %c0_i32 = arith.constant 0 : i32
    %c0_i32_0 = arith.constant 0 : i32
    return %arg0, %arg1, %c0_i32 : i32, i32, i32
  }
  func.func @transform_2(%arg0: i32, %arg1: i32) -> (i32, i32, i32) {
    %c0_i32 = arith.constant 0 : i32
    %c0_i32_0 = arith.constant 0 : i32
    return %arg0, %arg1, %c0_i32 : i32, i32, i32
  }
}

</mosaic_0001>

<bundles_post_ra>
// kernel: tpu_custom_call.1
= control target key start
LH: loop header
LB: loop body
LE: loop exit
PB: predicated region body
PF: predicated region fallthrough
CT: control target
= control target key end

     0   :  { %7 = vsyncpa [#allocation5], 0  ;;  %s689_s0 = inlined_call_operand.hbm [shape: f32[2], index: 0, kind: input, shape index: {}]   ;;  %s690_s1 = inlined_call_operand.hbm [shape: f32[2,8,128], index: 1, kind: input, shape index: {}]   ;;  %s691_s2 = inlined_call_operand.hbm [shape: f32[2,8,128], index: 2, kind: output, shape index: {}]  }
   0x1   :  { %8 = vsyncpa [#allocation3], 0 }
   0x2   :  { %10 = vsyncpa [#allocation3 + $0x1], 0 }
   0x3   :  { %11 = vsyncpa [#allocation4], 0 }
   0x4   :  { %13 = vsyncpa [#allocation4 + $0x1], 0  ;;  %s543_s9 = smov 0   ;;  %s545_s10 = smov 0  }
   0x5   :  { %s547_s11 = smov 0   ;;  %s549_s12 = smov 0  }
   0x6   :  { %s551_s13 = smov 0   ;;  %s553_s14 = smov 0  }
   0x7 LB: > { %s306_s15 = sadd.s32 4294967295, %s525_s14   ;;  %s307_s16 = sadd.s32 4294967294, %s525_s14   ;;  %s525_s14 = sphi %s553_s14, %s19_s14   ;;  %s521_s13 = sphi %s551_s13, %s703_s13   ;;  %s517_s12 = sphi %s549_s12, %s702_s12   ;;  %s513_s11 = sphi %s547_s11, %s701_s11   ;;  %s509_s10 = sphi %s545_s10, %s700_s10   ;;  %s505_s9 = sphi %s543_s9, %s699_s9  }
   0x8   : > { %p74_p0 = scmp.ne.s32.totalorder %s509_s10, %s505_s9  ;;  %p577_p1 = scmp.eq.s32.totalorder %s306_s15, 0 }
   0x9   : > { %p581_p2 = scmp.eq.s32.totalorder %s306_s15, 1  ;;  %p106_p3 = scmp.eq.s32.totalorder %s307_s16, 1 }
   0xa   : > { %p587_p4 = por %p577_p1, %p74_p0  ;;  %p308_p5 = scmp.ge.s32.totalorder %s525_s14, 1 }
   0xb   : > { %p592_p6 = por %p106_p3, %p74_p0  ;;  %p113_p7 = scmp.lt.s32.totalorder %s525_s14, 3 }
   0xc   : > { %s125_s23 = sshll.u32 %s689_s0, 4  ;;  %s31_s25 = sadd.s32 1, %s521_s13  ;;  %s126_s23 = int_to_ptr.hbm [resolvable:$true] %s125_s23 }
   0xd   : > { %p600_p8 = pnand %p308_p5, %p113_p7  ;;  %s61_s26 = sadd.s32 1, %s513_s11 }
   0xe   : > { %p33_p12 = scmp.ge.s32.totalorder %s31_s25, 2  ;;  %s527_s27 = smov [#allocation2]  }
   0xf   : > { %p329_p10 = pneg %p600_p8  ;;  %p68_p13 = scmp.ne.s32.totalorder %s513_s11, %s509_s10 }
  0x10   : > { %s705_s25 = smov (%p33_p12, %s31_s25), 0  ;;  %p69_p0 = scmp.eq.s32.totalorder %s525_s14, 0 }
  0x11   : > { %p330_p11 = pnand %p329_p10, %p577_p1  ;;  %s56_s28 = ssub.s32 %s521_s13, %s705_s25 }
  0x12   : > { %p342_p3 = scmp.lt.s32.totalorder %s525_s14, 2  ;;  %p59_p5 = scmp.eq.s32.totalorder %s56_s28, 0 }
  0x13   : > { %332 = dma.hbm_to_smem (!%p330_p11), %s126_s23, 16, %s527_s27, [#allocation5]  }
  0x14   : > { %p70_p7 = por %p69_p0, %p68_p13  ;;  %p621_p9 = por %p581_p2, %p68_p13 }
  0x15   : > { %s136_s30 = sand.u32 1, %s513_s11   ;;  %s312_s5 = sshll.u32 %s521_s13, 3 }
  0x16   : > { %s627_s3 = scalar_select %p59_p5, %s513_s11, %s61_s26  }
  0x17   : > { %s311_s4 = sshll.u32 %s136_s30, 3  ;;  %s145_s8 = scalar_lea.hbm %s690_s1, %s312_s5 }
  0x18   : > { %s140_s15 = scalar_lea.vmem [#allocation6], %s311_s4  ;;  %s147_s21 = sshll.u32 %s145_s8, 4  ;;  %s148_s21 = int_to_ptr.hbm [resolvable:$true] %s147_s21 }
  0x19   : > { %s149_s16 = sshll.u32 %s140_s15, 4  ;;  %p334_p10 = pnand %p342_p3, %p70_p7  ;;  %s150_s16 = int_to_ptr.vmem [resolvable:$true] %s149_s16 }
  0x1a   : > { %s137_s18 = scalar_lea.sflag [#allocation3], %s136_s30  ;;  %158 = sbr.rel (%p600_p8) target bundleno = 53 (0x35), region = 28 }
  0x1b   : > { %336 = dma.hbm_to_vmem [thread:$0]  (!%p334_p10), %s148_s21, 128, %s150_s16, %s137_s18  }
  0x1f   : > { %492 = dma.done.wait (%p577_p1), [#allocation5], 16  }
  0x20   : > { %494 = vsyncadd (%p577_p1), [#allocation5], 4294967280  ;;  %s642_s22 = sand.u32 1, %s509_s10  }
  0x21   : > { %s315_s23 = sshll.u32 %s642_s22, 3  ;;  %s166_s26 = scalar_lea.sflag [#allocation3], %s642_s22 }
  0x22   : > { %s169_s27 = scalar_lea.vmem [#allocation6], %s315_s23 }
  0x23   : > { %496 = dma.done.wait (%p587_p4), %s166_s26, 128  }
  0x24   : > { %498 = vsyncadd (%p587_p4), %s166_s26, 4294967168 }
  0x25   : > { %175 = sfence }
  0x26   : > { %s192_s17 = sld [smem:[#allocation2 + %s517_s12]]  ;;  %s318_s24 = sshll.u32 %s517_s12, 3  ;;  %v193_v0 = vld [vmem:[%s169_s27] sm:$0xff] }
  0x27   : > { %s209_s4 = scalar_lea.hbm %s691_s2, %s318_s24  ;;  %s191_s5 = scalar_lea.vmem [#allocation7], %s315_s23 }
  0x28   : > { %s211_s6 = sshll.u32 %s191_s5, 4  ;;  %s213_s7 = sshll.u32 %s209_s4, 4  ;;  %s212_s6 = int_to_ptr.vmem [resolvable:$true] %s211_s6  ;;  %s214_s7 = int_to_ptr.hbm [resolvable:$true] %s213_s7 }
  0x29   : > { %s198_s19 = scalar_lea.sflag [#allocation4], %s642_s22  ;;  %s453_s8 = sshra.s32 %s214_s7, 4  ;;  %s454_s8 = int_to_ptr.hbm [resolvable:$true] %s453_s8 }
  0x2a   : > { %s455_s15 = scalar_lea.hbm %s454_s8, 8  ;;  %s459_s21 = scalar_lea.hbm %s691_s2, 16 }
  0x2b   : > { %p456_p1 = scmp.ne.s32.totalorder %s454_s8, %s455_s15  ;;  %p460_p8 = scmp.lt.s32.totalorder %s454_s8, %s691_s2 }
  0x2c   : > { %v194_v1 = vstv %s192_s17  ;;  %p461_p11 = scmp.lt.s32.totalorder %s459_s21, %s455_s15 }
  0x2d   : > { %v195_v2 = vmul.f32 %v194_v1, %v193_v0  ;;  %p457_p2 = pnand %p456_p1, %p621_p9 }
  0x2e   : > { %p462_p12 = por %p461_p11, %p460_p8 }
  0x2f   : > { %196 = vst [vmem:[%s191_s5] sm:$0xff] %v195_v2  ;;  %p458_p4 = pneg %p457_p2 }
  0x31   : > { %p463_p13 = pnand %p462_p12, %p458_p4 }
  0x33   : > { %466 = shalt.err (!%p463_p13)
}
  0x34   : > { %327 = dma.vmem_to_hbm [thread:$0]  (%p621_p9), %s212_s6, 128, %s214_s7, %s198_s19  }
  0x35 PF: > { %s225_s22 = sand.u32 1, %s505_s9   ;;  %p698_p0 = scmp.ge.s32.totalorder %s525_s14, 2 }
  0x36   : > { %s226_s26 = scalar_lea.sflag [#allocation4], %s225_s22 }
  0x37   : > { %p338_p3 = pnand %p698_p0, %p592_p6 }
  0x39   : > { %p339_p5 = pneg %p338_p3 }
  0x3b   : > { %500 = dma.done.wait (%p339_p5), %s226_s26, 128  }
  0x3c   : > { %502 = vsyncadd (%p339_p5), %s226_s26, 4294967168  ;;  %s19_s14 = sadd.s32 1, %s525_s14   ;;  %s699_s9 = smov %s509_s10 }
  0x3d   : > { %p16_p7 = scmp.ge.s32.totalorder %s19_s14, 4   ;;  %s700_s10 = smov %s513_s11 }
  0x3e   : > { %s701_s11 = smov %s627_s3  ;;  %s702_s12 = smov %s521_s13 }
  0x3f   : > { %s703_s13 = smov %s705_s25  ;;  %18 = sbr.rel (!%p16_p7) target bundleno = 7 (0x7), region = 78 }
  0x44   :  { %232 = vsyncpa [#allocation3], 1 }
  0x45   :  { %234 = vsyncpa [#allocation3 + $0x1], 1 }
  0x46   :  { %235 = vsyncpa [#allocation4], 1 }
  0x47   :  { %237 = vsyncpa [#allocation4 + $0x1], 1 }
  0x48   :  { %238 = vsyncpa [#allocation5], 1 }
  0x49   :  { %240 = vsyncpa [#allocation5 + $0x1], 1 }

</bundles_post_ra>
